<compile_context>
chip_gen: v7x
topology: tpu7x:2x2x1
jax: 0.10.0
libtpu: 0.0.40
codegen_flags: <defaults>
</compile_context>

<pallas_src>
import functools

import jax
import jax.numpy as jnp
from jax.experimental import pallas as pl
from jax.experimental.pallas import tpu as pltpu

_LANE = 128
_SUBLANE = 8


def _round_up(v, m):
    return ((v + m - 1) // m) * m


def _vmem_capacity_bytes():
    try:
        return int(pltpu.get_tpu_info().vmem_capacity_bytes)
    except Exception:
        return 64 * 1024 * 1024  # conservative: v7x per-TensorCore VMEM


def _pick_tiles(n, c, itemsize):
    """Pick (tile_n, tile_c) so the double-buffered native x blocks plus the
    in-kernel f32 intermediates fit VMEM, while each DMA block stays big enough
    (multi-MiB) to amortize the ~0.35us per-grid-step overhead."""
    vmem = _vmem_capacity_bytes()
    budget = vmem // 2                       # headroom: pipeline bookkeeping, targets, output
    bpe = 2 * itemsize + 3 * 4               # 2 double-buffered native copies + ~3 f32 temps
    max_elems = budget // bpe
    max_elems = min(max_elems, (8 * 1024 * 1024) // itemsize)   # per-DMA-block cap ~8 MiB
    max_elems = max(max_elems, _SUBLANE * _LANE)

    n_pad = _round_up(max(n, 1), _SUBLANE)
    c_lanes = _round_up(max(c, 1), _LANE)

    tile_n_full_c = (max_elems // c_lanes) // _SUBLANE * _SUBLANE
    if tile_n_full_c >= min(128, n_pad):
        # Common case: whole class axis in one block.
        tile_c = c
        tile_n = min(max(tile_n_full_c, _SUBLANE), 1024, n_pad)
        # v7x has 2 TensorCores: give the 'parallel' batch grid >= 2 tiles.
        if tile_n >= n_pad and n_pad >= 2 * _SUBLANE:
            tile_n = _round_up(n_pad // 2, _SUBLANE)
    else:
        # Vocab-scale C: tile the class axis too (online-LSE carry in the kernel).
        tile_n = min(n_pad, 256)
        tile_c = (max_elems // tile_n) // _LANE * _LANE
        tile_c = max(_LANE, min(tile_c, c_lanes))
        if tile_c >= c:
            tile_c = c
    return tile_n, tile_c


def _label_smoothing_kernel(x_ref, tgt_ref, out_ref, m_sc, l_sc, lin_sc, *,
                            n_total, c_total, confidence, smoothing, mask_cols):
    i = pl.program_id(0)
    j = pl.program_id(1)
    last_j = pl.num_programs(1) - 1

    @pl.when(j == 0)
    def _():
        m_sc[...] = jnp.full(m_sc.shape, -jnp.inf, jnp.float32)
        l_sc[...] = jnp.zeros(l_sc.shape, jnp.float32)
        lin_sc[...] = jnp.zeros(lin_sc.shape, jnp.float32)

    x = x_ref[...].astype(jnp.float32)                      # (tile_n, tile_c)
    tile_n, tile_c = x.shape
    tgt = tgt_ref[...]                                       # (tile_n, 1) int32

    col = j * tile_c + jax.lax.broadcasted_iota(jnp.int32, (tile_n, tile_c), 1)

    if mask_cols:
        valid = col < c_total
        x_for_max = jnp.where(valid, x, -jnp.inf)            # padded cols never win / exp->0
        x_for_sum = jnp.where(valid, x, 0.0)
    else:
        x_for_max = x
        x_for_sum = x

    # ---- online log-sum-exp carry over the class axis ------------------------
    m_blk = jnp.max(x_for_max, axis=-1, keepdims=True)                # (tile_n, 1)
    m_new = jnp.maximum(m_sc[...], m_blk)
    e = jnp.exp(x_for_max - m_new)           # the only full-tile transcendental pass
    alpha = jnp.exp(m_sc[...] - m_new)       # j==0: exp(-inf - finite) == 0
    l_sc[...] = l_sc[...] * alpha + jnp.sum(e, axis=-1, keepdims=True)
    m_sc[...] = m_new

    # ---- linear-in-x terms: no shift needed ----------------------------------
    # loss_row = lse - confidence*x[target] - (smoothing/C)*sum(x)
    x_t_blk = jnp.sum(jnp.where(col == tgt, x, 0.0), axis=-1, keepdims=True)
    sum_x_blk = jnp.sum(x_for_sum, axis=-1, keepdims=True)
    lin_sc[...] += confidence * x_t_blk + (smoothing / c_total) * sum_x_blk
    # TODO(synk): on v6e/v7x with bf16 inputs, sum_x_blk could ride the idle MXU
    # slot via jnp.dot(x, ones); gate on a bundle-level VALU-saturation check.

    # ---- finalize: per-row loss and lane-dense per-tile partial sum ----------
    @pl.when(j == last_j)
    def _():
        lse = m_sc[...] + jnp.log(l_sc[...])                          # (tile_n, 1)
        per_row = lse - lin_sc[...]
        row = i * tile_n + jax.lax.broadcasted_iota(jnp.int32, (tile_n, 1), 0)
        # select (not multiply): padded rows may hold garbage/NaN from the DMA.
        per_row = jnp.where(row < n_total, per_row, 0.0)
        tile_sum = jnp.sum(per_row)
        out_ref[...] = jnp.broadcast_to(tile_sum, out_ref.shape).astype(jnp.float32)


def label_smoothing_loss(x, target, smoothing=0.1, tile_n=None, tile_c=None):
    """x: (N, C) logits (any float dtype); target: (N,) int labels. -> scalar loss."""
    confidence = 1.0 - smoothing
    n, c = x.shape
    itemsize = jnp.dtype(x.dtype).itemsize
    auto_n, auto_c = _pick_tiles(n, c, itemsize)
    if tile_n is None:
        tile_n = auto_n
    if tile_c is None:
        tile_c = auto_c
    num_n = pl.cdiv(n, tile_n)
    num_c = pl.cdiv(c, tile_c)
    mask_cols = (c % tile_c) != 0

    tgt2d = target.astype(jnp.int32).reshape(n, 1)

    kernel = functools.partial(
        _label_smoothing_kernel,
        n_total=n, c_total=c, confidence=confidence, smoothing=smoothing,
        mask_cols=mask_cols)

    vmem_cap = _vmem_capacity_bytes()
    vmem_limit = max(32 * 1024 * 1024, min(int(vmem_cap * 0.9), 128 * 1024 * 1024))

    partials = pl.pallas_call(
        kernel,
        out_shape=jax.ShapeDtypeStruct((num_n, 8, 128), jnp.float32),
        grid=(num_n, num_c),
        in_specs=[
            pl.BlockSpec((tile_n, tile_c), lambda i, j: (i, j)),   # logits, native dtype
            pl.BlockSpec((tile_n, 1), lambda i, j: (i, 0)),        # targets
        ],
        out_specs=pl.BlockSpec((1, 8, 128), lambda i, j: (i, 0, 0)),
        scratch_shapes=[
            pltpu.VMEM((tile_n, 1), jnp.float32),   # running row max
            pltpu.VMEM((tile_n, 1), jnp.float32),   # running exp-sum
            pltpu.VMEM((tile_n, 1), jnp.float32),   # conf*x[t] + (eps/C)*sum(x)
        ],
        compiler_params=pltpu.CompilerParams(
            dimension_semantics=("parallel", "arbitrary"),
            vmem_limit_bytes=vmem_limit),
    )(x, tgt2d)

    # Tiny final reduction over per-tile partials; divide by the true N once.
    return jnp.sum(partials[:, 0, 0]) / n


def _reference(x, target, smoothing=0.1):
    confidence = 1.0 - smoothing
    logprobs = jax.nn.log_softmax(x.astype(jnp.float32), axis=-1)
    nll = -jnp.take_along_axis(
        logprobs, target[:, None].astype(jnp.int32), axis=-1)[:, 0]
    smooth = -jnp.mean(logprobs, axis=-1)
    return jnp.mean(confidence * nll + smoothing * smooth)


if __name__ == "__main__":
    key = jax.random.PRNGKey(0)
    k1, k2, k3, k4, k5, k6 = jax.random.split(key, 6)
    smoothing = 0.1

    # Case 1: small single-tile case (auto tiles).
    N, C = 8, 32
    x = jax.random.normal(k1, (N, C), dtype=jnp.float32)
    target = jax.random.randint(k2, (N,), 0, C, dtype=jnp.int32)
    loss = jax.block_until_ready(label_smoothing_loss(x, target, smoothing))
    ref = _reference(x, target, smoothing)
    assert jnp.allclose(loss, ref, atol=1e-5, rtol=1e-5), (loss, ref)

    # Case 2: multi-tile on both axes with partial last tiles (exercises the
    # online-LSE carry, column masking and row masking).
    N2, C2 = 24, 160
    x2 = jax.random.normal(k3, (N2, C2), dtype=jnp.float32)
    target2 = jax.random.randint(k4, (N2,), 0, C2, dtype=jnp.int32)
    loss2 = jax.block_until_ready(
        label_smoothing_loss(x2, target2, smoothing, tile_n=16, tile_c=128))
    ref2 = _reference(x2, target2, smoothing)
    assert jnp.allclose(loss2, ref2, atol=1e-5, rtol=1e-5), (loss2, ref2)

    # Case 3: bf16 logits with auto tiles (native-dtype HBM stream, batch split
    # into >=2 tiles for the parallel grid axis).
    N3, C3 = 40, 256
    x3 = jax.random.normal(k5, (N3, C3), dtype=jnp.bfloat16)
    target3 = jax.random.randint(k6, (N3,), 0, C3, dtype=jnp.int32)
    loss3 = jax.block_until_ready(label_smoothing_loss(x3, target3, smoothing))
    ref3 = _reference(x3, target3, smoothing)
    assert jnp.allclose(loss3, ref3, atol=1e-4, rtol=1e-4), (loss3, ref3)

    print("KERNEL_OK")
</pallas_src>

<mosaic_0001>
module attributes {stable_mosaic.version = 11 : i64} {
  func.func @_label_smoothing_kernel(%arg0: i32, %arg1: i32, %arg2: memref<8x32xf32, #tpu.memory_space<vmem>>, %arg3: memref<8x1xi32, #tpu.memory_space<vmem>>, %arg4: memref<1x8x128xf32, #tpu.memory_space<vmem>>, %arg5: memref<8x1xf32, #tpu.memory_space<vmem>>, %arg6: memref<8x1xf32, #tpu.memory_space<vmem>>, %arg7: memref<8x1xf32, #tpu.memory_space<vmem>>) attributes {dimension_semantics = [#tpu.dimension_semantics<parallel>, #tpu.dimension_semantics<arbitrary>], iteration_bounds = array<i64: 1, 1>, scalar_prefetch = 0 : i64, scratch_operands = 3 : i64, tpu.core_type = #tpu.core_type<tc>, window_params = [{transform_indices = @transform_0, window_bounds = array<i64: 8, 32>}, {transform_indices = @transform_1, window_bounds = array<i64: 8, 1>}, {transform_indices = @transform_2, window_bounds = array<i64: 1, 8, 128>}]} {
    %c0_i32 = arith.constant 0 : i32
    %0 = arith.cmpi eq, %arg1, %c0_i32 : i32
    %1 = arith.extui %0 : i1 to i32
    %c0_i32_0 = arith.constant 0 : i32
    %2 = arith.cmpi ne, %1, %c0_i32_0 : i32
    scf.if %2 {
      %cst_26 = arith.constant 0xFF800000 : f32
      %45 = vector.broadcast %cst_26 : f32 to vector<8x1xf32>
      %c0_27 = arith.constant 0 : index
      %c0_28 = arith.constant 0 : index
      %46 = vector.load %arg5[%c0_27, %c0_28] : memref<8x1xf32, #tpu.memory_space<vmem>>, vector<8x1xf32>
      tpu.vector_store %arg5[%c0_27, %c0_28], %45 {strides = array<i32>} : memref<8x1xf32, #tpu.memory_space<vmem>>, vector<8x1xf32>,
      %cst_29 = arith.constant 0.000000e+00 : f32
      %47 = vector.broadcast %cst_29 : f32 to vector<8x1xf32>
      %c0_30 = arith.constant 0 : index
      %c0_31 = arith.constant 0 : index
      %48 = vector.load %arg6[%c0_30, %c0_31] : memref<8x1xf32, #tpu.memory_space<vmem>>, vector<8x1xf32>
      tpu.vector_store %arg6[%c0_30, %c0_31], %47 {strides = array<i32>} : memref<8x1xf32, #tpu.memory_space<vmem>>, vector<8x1xf32>,
      %cst_32 = arith.constant 0.000000e+00 : f32
      %49 = vector.broadcast %cst_32 : f32 to vector<8x1xf32>
      %c0_33 = arith.constant 0 : index
      %c0_34 = arith.constant 0 : index
      %50 = vector.load %arg7[%c0_33, %c0_34] : memref<8x1xf32, #tpu.memory_space<vmem>>, vector<8x1xf32>
      tpu.vector_store %arg7[%c0_33, %c0_34], %49 {strides = array<i32>} : memref<8x1xf32, #tpu.memory_space<vmem>>, vector<8x1xf32>,
    } else {
    }
    %c0 = arith.constant 0 : index
    %c0_1 = arith.constant 0 : index
    %3 = vector.load %arg2[%c0, %c0_1] : memref<8x32xf32, #tpu.memory_space<vmem>>, vector<8x32xf32>
    %c0_2 = arith.constant 0 : index
    %c0_3 = arith.constant 0 : index
    %4 = vector.load %arg3[%c0_2, %c0_3] : memref<8x1xi32, #tpu.memory_space<vmem>>, vector<8x1xi32>
    %c32_i32 = arith.constant 32 : i32
    %5 = arith.muli %arg1, %c32_i32 : i32
    %6 = tpu.iota {dimensions = array<i32: 1>} : vector<8x32xi32>
    %7 = vector.broadcast %5 : i32 to vector<8x32xi32>
    %8 = arith.addi %7, %6 : vector<8x32xi32>
    %cst = arith.constant dense<0xFF800000> : vector<8xf32>
    %9 = vector.multi_reduction <maximumf>, %3, %cst [1] : vector<8x32xf32> to vector<8xf32>
    %10 = vector.shape_cast %9 : vector<8xf32> to vector<8x1xf32>
    %c0_4 = arith.constant 0 : index
    %c0_5 = arith.constant 0 : index
    %11 = vector.load %arg5[%c0_4, %c0_5] : memref<8x1xf32, #tpu.memory_space<vmem>>, vector<8x1xf32>
    %12 = arith.maximumf %11, %10 : vector<8x1xf32>
    %13 = vector.broadcast %12 : vector<8x1xf32> to vector<8x32xf32>
    %14 = arith.subf %3, %13 : vector<8x32xf32>
    %15 = math.exp %14 : vector<8x32xf32>
    %c0_6 = arith.constant 0 : index
    %c0_7 = arith.constant 0 : index
    %16 = vector.load %arg5[%c0_6, %c0_7] : memref<8x1xf32, #tpu.memory_space<vmem>>, vector<8x1xf32>
    %17 = arith.subf %16, %12 : vector<8x1xf32>
    %18 = math.exp %17 : vector<8x1xf32>
    %c0_8 = arith.constant 0 : index
    %c0_9 = arith.constant 0 : index
    %19 = vector.load %arg6[%c0_8, %c0_9] : memref<8x1xf32, #tpu.memory_space<vmem>>, vector<8x1xf32>
    %20 = arith.mulf %19, %18 : vector<8x1xf32>
    %cst_10 = arith.constant dense<0.000000e+00> : vector<8xf32>
    %21 = vector.multi_reduction <add>, %15, %cst_10 [1] : vector<8x32xf32> to vector<8xf32>
    %22 = vector.shape_cast %21 : vector<8xf32> to vector<8x1xf32>
    %23 = arith.addf %20, %22 : vector<8x1xf32>
    %c0_11 = arith.constant 0 : index
    %c0_12 = arith.constant 0 : index
    %24 = vector.load %arg6[%c0_11, %c0_12] : memref<8x1xf32, #tpu.memory_space<vmem>>, vector<8x1xf32>
    tpu.vector_store %arg6[%c0_11, %c0_12], %23 {strides = array<i32>} : memref<8x1xf32, #tpu.memory_space<vmem>>, vector<8x1xf32>,
    %c0_13 = arith.constant 0 : index
    %c0_14 = arith.constant 0 : index
    %25 = vector.load %arg5[%c0_13, %c0_14] : memref<8x1xf32, #tpu.memory_space<vmem>>, vector<8x1xf32>
    tpu.vector_store %arg5[%c0_13, %c0_14], %12 {strides = array<i32>} : memref<8x1xf32, #tpu.memory_space<vmem>>, vector<8x1xf32>,
    %26 = vector.broadcast %4 : vector<8x1xi32> to vector<8x32xi32>
    %27 = arith.cmpi eq, %8, %26 : vector<8x32xi32>
    %cst_15 = arith.constant 0.000000e+00 : f32
    %28 = vector.broadcast %cst_15 : f32 to vector<8x32xf32>
    %29 = arith.select %27, %3, %28 : vector<8x32xi1>, vector<8x32xf32>
    %cst_16 = arith.constant dense<0.000000e+00> : vector<8xf32>
    %30 = vector.multi_reduction <add>, %29, %cst_16 [1] : vector<8x32xf32> to vector<8xf32>
    %31 = vector.shape_cast %30 : vector<8xf32> to vector<8x1xf32>
    %cst_17 = arith.constant dense<0.000000e+00> : vector<8xf32>
    %32 = vector.multi_reduction <add>, %3, %cst_17 [1] : vector<8x32xf32> to vector<8xf32>
    %33 = vector.shape_cast %32 : vector<8xf32> to vector<8x1xf32>
    %c0_18 = arith.constant 0 : index
    %c0_19 = arith.constant 0 : index
    %34 = vector.load %arg7[%c0_18, %c0_19] : memref<8x1xf32, #tpu.memory_space<vmem>>, vector<8x1xf32>
    %cst_20 = arith.constant 0.899999976 : f32
    %35 = vector.broadcast %cst_20 : f32 to vector<8x1xf32>
    %36 = arith.mulf %35, %31 : vector<8x1xf32>
    %cst_21 = arith.constant 3.125000e-03 : f32
    %37 = vector.broadcast %cst_21 : f32 to vector<8x1xf32>
    %38 = arith.mulf %37, %33 : vector<8x1xf32>
    %39 = arith.addf %36, %38 : vector<8x1xf32>
    %40 = arith.addf %34, %39 : vector<8x1xf32>
    %c0_22 = arith.constant 0 : index
    %c0_23 = arith.constant 0 : index
    %41 = vector.load %arg7[%c0_22, %c0_23] : memref<8x1xf32, #tpu.memory_space<vmem>>, vector<8x1xf32>
    tpu.vector_store %arg7[%c0_22, %c0_23], %40 {strides = array<i32>} : memref<8x1xf32, #tpu.memory_space<vmem>>, vector<8x1xf32>,
    %c0_i32_24 = arith.constant 0 : i32
    %42 = arith.cmpi eq, %arg1, %c0_i32_24 : i32
    %43 = arith.extui %42 : i1 to i32
    %c0_i32_25 = arith.constant 0 : i32
    %44 = arith.cmpi ne, %43, %c0_i32_25 : i32
    scf.if %44 {
      %c0_26 = arith.constant 0 : index
      %c0_27 = arith.constant 0 : index
      %45 = vector.load %arg5[%c0_26, %c0_27] : memref<8x1xf32, #tpu.memory_space<vmem>>, vector<8x1xf32>
      %c0_28 = arith.constant 0 : index
      %c0_29 = arith.constant 0 : index
      %46 = vector.load %arg6[%c0_28, %c0_29] : memref<8x1xf32, #tpu.memory_space<vmem>>, vector<8x1xf32>
      %47 = math.log %46 : vector<8x1xf32>
      %48 = arith.addf %45, %47 : vector<8x1xf32>
      %c0_30 = arith.constant 0 : index
      %c0_31 = arith.constant 0 : index
      %49 = vector.load %arg7[%c0_30, %c0_31] : memref<8x1xf32, #tpu.memory_space<vmem>>, vector<8x1xf32>
      %50 = arith.subf %48, %49 : vector<8x1xf32>
      %c8_i32 = arith.constant 8 : i32
      %51 = arith.muli %arg0, %c8_i32 : i32
      %52 = tpu.iota {dimensions = array<i32: 0>} : vector<8x1xi32>
      %53 = vector.broadcast %51 : i32 to vector<8x1xi32>
      %54 = arith.addi %53, %52 : vector<8x1xi32>
      %c8_i32_32 = arith.constant 8 : i32
      %55 = vector.broadcast %c8_i32_32 : i32 to vector<8x1xi32>
      %56 = arith.cmpi slt, %54, %55 : vector<8x1xi32>
      %cst_33 = arith.constant 0.000000e+00 : f32
      %57 = vector.broadcast %cst_33 : f32 to vector<8x1xf32>
      %58 = arith.select %56, %50, %57 : vector<8x1xi1>, vector<8x1xf32>
      %59 = vector.shape_cast %58 : vector<8x1xf32> to vector<1x8x1xf32>
      %cst_34 = arith.constant dense<0.000000e+00> : vector<1xf32>
      %60 = vector.multi_reduction <add>, %59, %cst_34 [1, 2] : vector<1x8x1xf32> to vector<1xf32>
      %61 = vector.shape_cast %60 : vector<1xf32> to vector<1x1x1xf32>
      %62 = vector.extract %61[0, 0, 0] : f32 from vector<1x1x1xf32>
      %63 = vector.broadcast %62 : f32 to vector<1x8x128xf32>
      %c0_35 = arith.constant 0 : index
      %c0_36 = arith.constant 0 : index
      %c0_37 = arith.constant 0 : index
      %64 = vector.load %arg4[%c0_35, %c0_36, %c0_37] : memref<1x8x128xf32, #tpu.memory_space<vmem>>, vector<1x8x128xf32>
      tpu.vector_store %arg4[%c0_35, %c0_36, %c0_37], %63 {strides = array<i32>} : memref<1x8x128xf32, #tpu.memory_space<vmem>>, vector<1x8x128xf32>,
    } else {
    }
    return
  }
  func.func @transform_0(%arg0: i32, %arg1: i32) -> (i32, i32) {
    %c0_i32 = arith.constant 0 : i32
    return %arg0, %arg1 : i32, i32
  }
  func.func @transform_1(%arg0: i32, %arg1: i32) -> (i32, i32) {
    %c0_i32 = arith.constant 0 : i32
    %c0_i32_0 = arith.constant 0 : i32
    return %arg0, %c0_i32 : i32, i32
  }
  func.func @transform_2(%arg0: i32, %arg1: i32) -> (i32, i32, i32) {
    %c0_i32 = arith.constant 0 : i32
    %c0_i32_0 = arith.constant 0 : i32
    %c0_i32_1 = arith.constant 0 : i32
    return %arg0, %c0_i32, %c0_i32_0 : i32, i32, i32
  }
}

</mosaic_0001>

<bundles_post_ra>
// kernel: tpu_custom_call.1
= control target key start
LH: loop header
LB: loop body
LE: loop exit
PB: predicated region body
PF: predicated region fallthrough
CT: control target
= control target key end

     0   :  { %vm27_vm0 = vcmask 261120   ;;  %s199_s0 = inlined_call_operand.vmem [shape: f32[8,32], index: 0, kind: input, shape index: {}]   ;;  %s200_s1 = inlined_call_operand.vmem [shape: s32[8,1], index: 1, kind: input, shape index: {}]   ;;  %s201_s2 = inlined_call_operand.hbm [shape: f32[1,8,128], index: 2, kind: output, shape index: {}]  }
   0x1   :  { %v20_v0 = vld [vmem:[%s199_s0] sm:$0xff] }
   0x2   :  { %7 = vsyncpa [#allocation6], 0  ;;  %v28_v1 = vsel %vm27_vm0, %v20_v0, -inf  ;;  %vm16_vm1 = vcmask 7168   ;;  %v151_v2 = vmov -inf   ;;  %v152_v3 = vmov 0  }
   0x3   :  { %29 = vmax.xlane.f32.xlu0 %v28_v1  ;;  %17 = vst.msk [vmem:[#allocation2] sm:$0xff] %vm16_vm1, %v151_v2  ;;  %120 = vset.pattern.permute.xlu1 %v152_v3  ;;  %v21_v4 = vld [vmem:[%s200_s1] sm:$0xff]  ;;  %v153_v5 = vmov 0.0   ;;  %v23_v13 = vlaneseq  ;;  %v61_v20 = vsel %vm27_vm0, %v20_v0, 0.0  ;;  %s154_s0 = smov [#allocation5]  }
   0x4   :  { %119 = vset.pattern.permute.xlu0 %v152_v3  ;;  %54 = vperm.xlu1 %120, %v21_v4   ;;  %18 = vst.msk [vmem:[#allocation3] sm:$0xff] %vm16_vm1, %v153_v5  ;;  %19 = vst.msk [vmem:[#allocation4] sm:$0xff] %vm16_vm1, %v153_v5  ;;  %s105_s1 = sshll.u32 %s154_s0, 4  ;;  %s106_s1 = int_to_ptr.vmem [resolvable:$true] %s105_s1 }
   0x5   :  { %v24_v14 = vand.u32 127, %v23_v13  ;;  %s127_s14 = scalar_lea.vmem %s106_s1, 128  ;;  %p132_p1 = scmp.lt.s32.totalorder %s106_s1, %s106_s1 }
   0x6   :  { %p128_p0 = scmp.ne.s32.totalorder %s106_s1, %s127_s14  ;;  %p133_p2 = scmp.lt.s32.totalorder %s127_s14, %s127_s14 }
   0x8   :  { %p134_p3 = por %p133_p2, %p132_p1 }
   0xa   :  { %v31_v6 = vld [vmem:[#allocation2] sm:$0xff]  ;;  %p135_p4 = pnand %p134_p3, %p128_p0 }
   0xb   :  { %v44_v23 = vld [vmem:[#allocation3] sm:$0xff]  ;;  %v64_v31 = vld [vmem:[#allocation4] sm:$0xff] }
  0x83   :  { %v55_v15 = vpop.permute.xlu1 %54 }
  0x84   :  { %vm56_vm2 = vcmp.eq.s32.totalorder %v24_v14, %v55_v15 }
  0x85   :  { %v57_v17 = vsel %vm56_vm2, %v20_v0, 0.0 }
  0x86   :  { %v58_v19 = vsel %vm27_vm0, %v57_v17, 0.0 }
  0x90   :  { %v30_v7 = vpop.xlane.xlu0 %29 }
  0x91   :  { %v32_v8 = vmax.f32 %v31_v6, %v30_v7 }
  0x93   :  { %v41_v9 = vsub.f32 %v31_v6, %v32_v8  ;;  %52 = vst.msk [vmem:[#allocation2] sm:$0xff] %vm16_vm1, %v32_v8  ;;  %35 = vperm.xlu0 %119, %v32_v8  }
  0x95   :  { %v42_v21 = vmul.f32 1.442695, %v41_v9 }
  0x9a   :  { %v73_v37 = vld [vmem:[#allocation2] sm:$0xff] }
 0x112   :  { %v36_v10 = vpop.permute.xlu0 %35 }
 0x113   :  { %v38_v11 = vsub.f32 %v20_v0, %v36_v10 }
 0x115   :  { %v39_v12 = vmul.f32 1.442695, %v38_v11 }
 0x117   :  { %121 = vpow2.f32 %v39_v12 }
 0x118   :  { %123 = vpow2.f32 %v42_v21 }
 0x121   :  { %v122_v16 = vpop.eup %121 }
 0x122   :  { %v46_v18 = vsel %vm27_vm0, %v122_v16, 0.0  ;;  %v124_v22 = vpop.eup %123 }
 0x123   :  { %47 = vadd.xlane.f32.xlu1 %v46_v18  ;;  %v45_v24 = vmul.f32 %v124_v22, %v44_v23 }
 0x127   :  { %59 = vadd.xlane.f32.xlu1 %v58_v19 }
 0x12b   :  { %62 = vadd.xlane.f32.xlu1 %v61_v20 }
 0x1b0   :  { %v48_v25 = vpop.xlane.xlu1 %47 }
 0x1b1   :  { %v49_v26 = vadd.f32 %v48_v25, %v45_v24 }
 0x1b3   :  { %51 = vst.msk [vmem:[#allocation3] sm:$0xff] %vm16_vm1, %v49_v26 }
 0x1b4   :  { %v60_v27 = vpop.xlane.xlu1 %59 }
 0x1b5   :  { %v65_v28 = vmul.f32 0.9, %v60_v27 }
 0x1b8   :  { %v63_v29 = vpop.xlane.xlu1 %62 }
 0x1b9   :  { %v66_v30 = vmul.f32 0.003125, %v63_v29 }
 0x1ba   :  { %v74_v32 = vld [vmem:[#allocation3] sm:$0xff] }
 0x1bb   :  { %v67_v33 = vadd.f32 %v66_v30, %v65_v28  ;;  %125 = vlog2.f32 %v74_v32 }
 0x1bd   :  { %v68_v34 = vadd.f32 %v67_v33, %v64_v31 }
 0x1bf   :  { %69 = vst.msk [vmem:[#allocation4] sm:$0xff] %vm16_vm1, %v68_v34 }
 0x1c5   :  { %v126_v35 = vpop.eup %125 }
 0x1c6   :  { %v76_v36 = vmul.f32 0.6931472, %v126_v35  ;;  %v78_v39 = vld [vmem:[#allocation4] sm:$0xff] }
 0x1c8   :  { %v77_v38 = vadd.f32 %v76_v36, %v73_v37 }
 0x1ca   :  { %v79_v40 = vsub.f32 %v77_v38, %v78_v39 }
 0x1cc   :  { %v87_v41 = vsel %vm16_vm1, %v79_v40, 0.0 }
 0x1cd   :  { %88 = vadd.xlane.f32.xlu0 %v87_v41 }
 0x25a   :  { %v89_v42 = vpop.xlane.xlu0 %88 }
 0x25b   :  { %v90_v43 = vrot.slane %v89_v42, 4 }
 0x25d   :  { %v91_v44 = vadd.f32 %v90_v43, %v89_v42 }
 0x25f   :  { %v92_v45 = vrot.slane %v91_v44, 2 }
 0x261   :  { %v93_v46 = vadd.f32 %v92_v45, %v91_v44 }
 0x263   :  { %v94_v47 = vrot.slane %v93_v46, 1 }
 0x265   :  { %v95_v48 = vadd.f32 %v94_v47, %v93_v46 }
 0x267   :  { %113 = vpush %v95_v48 }
 0x298   :  { %s114_s13 = spop %113 }
 0x299   :  { %v97_v49 = vstv %s114_s13 }
 0x29a   :  { %98 = vst [vmem:[#allocation5] sm:$0xff] %v97_v49 }
 0x29b   :  { %138 = shalt.err (!%p135_p4)
}
 0x29c   :  { %s139_s17 = scalar_lea.hbm %s201_s2, 128 }
 0x29d   :  { %p140_p5 = scmp.ne.s32.totalorder %s201_s2, %s139_s17  ;;  %p143_p6 = scmp.lt.u32.totalorder %s139_s17, %s201_s2 }
 0x29f   :  { %p145_p7 = pnand %p143_p6, %p140_p5 }
 0x2a1   :  { %148 = shalt.err (!%p145_p7)
}
 0x2a2   :  { %108 = dma.vmem_to_hbm [thread:$0]  %s106_s1, 128, %s201_s2, [#allocation6]  }
 0x2a3   :  { %149 = dma.done.wait [#allocation6], 128  }
 0x2a4   :  { %150 = vsyncadd [#allocation6], 4294967168 }
 0x2a5   :  { %112 = vsyncpa [#allocation6], 1 }

</bundles_post_ra>
